<compile_context>
chip_gen: v7x
topology: tpu7x:2x2x1
jax: 0.10.0
libtpu: 0.0.40
codegen_flags: <defaults>
</compile_context>

<pallas_src>
import math
from functools import partial

import jax
import jax.numpy as jnp
from jax.experimental import pallas as pl
from jax.experimental.pallas import tpu as pltpu


# ----------------------------- kernels ------------------------------------- #

def _rmsnorm_kernel(x_ref, g_ref, o_ref, *, scale):
    """Non-cond path. x_ref: (TILE_R, D), g_ref: (1, D), o_ref: (TILE_R, D)."""
    x = x_ref[...].astype(jnp.float32)                       # upcast once per tile
    ss = jnp.sum(x * x, axis=-1, keepdims=True)              # f32 accum (XLU)
    inv = jax.lax.rsqrt(jnp.maximum(ss, 1e-24))              # EUP; clamp_min(||x||,1e-12)
    g = g_ref[...].astype(jnp.float32)                       # (1, D) broadcasts over rows
    o_ref[...] = (x * inv * (scale * g)).astype(o_ref.dtype)


def _rmsnorm_cond_kernel(x_ref, g_ref, cg_ref, cb_ref, o_ref, *, scale):
    """Cond path. x_ref: (1, TILE_N, D); g/cg/cb refs: (1, 1, D)."""
    x = x_ref[...].astype(jnp.float32)
    ss = jnp.sum(x * x, axis=-1, keepdims=True)
    inv = jax.lax.rsqrt(jnp.maximum(ss, 1e-24))
    g = g_ref[...].astype(jnp.float32)                       # (1, 1, D)
    cg = cg_ref[...].astype(jnp.float32)                     # (1, 1, D) per-batch
    cb = cb_ref[...].astype(jnp.float32)
    out = x * inv * (scale * g)
    out = out * cg + cb
    o_ref[...] = out.astype(o_ref.dtype)


# ----------------------------- wrapper -------------------------------------- #

def rmsnorm(x, gamma=None, cond=None, w_gb=None, b_gb=None):
    """RMSNorm forward matching the PyTorch module.

    x:     (B, N, D)
    gamma: (D,) or None (scale=False in the module -> gamma = 1)
    cond:  (B, dim_cond) or None
    w_gb:  (dim_cond, 2*D) weight of the Linear producing [gamma | beta]
    b_gb:  (2*D,) bias of that Linear
    """
    B, N, D = x.shape
    scale = math.sqrt(D)
    itemsize = jnp.dtype(x.dtype).itemsize

    if gamma is None:
        gamma = jnp.ones((D,), x.dtype)

    if cond is None:
        # --- non-cond path: flatten (B, N) -> rows, grid over rows only ---
        R = B * N
        xr = x.reshape(R, D)
        g2 = gamma.reshape(1, D)
        tile_r = R if R <= 512 else 512
        grid = (pl.cdiv(R, tile_r),)

        out = pl.pallas_call(
            partial(_rmsnorm_kernel, scale=scale),
            out_shape=jax.ShapeDtypeStruct((R, D), x.dtype),
            grid_spec=pltpu.PrefetchScalarGridSpec(
                num_scalar_prefetch=0,
                grid=grid,
                in_specs=[
                    pl.BlockSpec((tile_r, D), lambda i: (i, 0)),
                    # gamma: constant index_map -> DMA'd once, stays resident
                    pl.BlockSpec((1, D), lambda i: (0, 0)),
                ],
                out_specs=pl.BlockSpec((tile_r, D), lambda i: (i, 0)),
            ),
            compiler_params=pltpu.CompilerParams(
                dimension_semantics=("parallel",),
                vmem_limit_bytes=64 * 1024 * 1024,
            ),
            cost_estimate=pl.CostEstimate(
                flops=4 * R * D,
                transcendentals=R,
                bytes_accessed=2 * R * D * itemsize + D * itemsize,
            ),
        )(xr, g2)
        return out.reshape(B, N, D)

    # --- cond path ---
    assert w_gb is not None and b_gb is not None
    # Tiny (B, dim_cond) x (dim_cond, 2D) projection done ONCE per batch via XLA.
    gb = (cond.astype(jnp.float32) @ w_gb.astype(jnp.float32)
          + b_gb.astype(jnp.float32))                               # (B, 2D)
    cg = gb[:, :D].reshape(B, 1, D).astype(x.dtype)
    cb = gb[:, D:].reshape(B, 1, D).astype(x.dtype)
    g3 = gamma.reshape(1, 1, D)

    tile_n = N if N <= 512 else 512
    grid = (B, pl.cdiv(N, tile_n))

    out = pl.pallas_call(
        partial(_rmsnorm_cond_kernel, scale=scale),
        out_shape=jax.ShapeDtypeStruct((B, N, D), x.dtype),
        grid_spec=pltpu.PrefetchScalarGridSpec(
            num_scalar_prefetch=0,
            grid=grid,
            in_specs=[
                pl.BlockSpec((1, tile_n, D), lambda bi, ni: (bi, ni, 0)),
                # gamma: constant across the whole grid -> resident
                pl.BlockSpec((1, 1, D), lambda bi, ni: (0, 0, 0)),
                # cond gamma/beta: depend only on batch index, constant across
                # the sequence-tile axis -> not re-DMA'd per tile
                pl.BlockSpec((1, 1, D), lambda bi, ni: (bi, 0, 0)),
                pl.BlockSpec((1, 1, D), lambda bi, ni: (bi, 0, 0)),
            ],
            out_specs=pl.BlockSpec((1, tile_n, D), lambda bi, ni: (bi, ni, 0)),
        ),
        compiler_params=pltpu.CompilerParams(
            dimension_semantics=("parallel", "parallel"),
            vmem_limit_bytes=64 * 1024 * 1024,
        ),
        cost_estimate=pl.CostEstimate(
            flops=6 * B * N * D,
            transcendentals=B * N,
            bytes_accessed=2 * B * N * D * itemsize + 3 * B * D * itemsize,
        ),
    )(x, g3, cg, cb)
    return out


# ----------------------------- reference + demo ----------------------------- #

def _reference(x, gamma=None, cond=None, w_gb=None, b_gb=None):
    D = x.shape[-1]
    g = gamma if gamma is not None else 1.0
    nrm = jnp.maximum(jnp.linalg.norm(x.astype(jnp.float32), axis=-1, keepdims=True),
                      1e-12)
    out = x.astype(jnp.float32) / nrm * math.sqrt(D) * g
    if cond is None:
        return out.astype(x.dtype)
    gb = cond.astype(jnp.float32) @ w_gb.astype(jnp.float32) + b_gb.astype(jnp.float32)
    cg, cb = gb[:, :D], gb[:, D:]
    return (out * cg[:, None, :] + cb[:, None, :]).astype(x.dtype)


if __name__ == "__main__":
    key = jax.random.PRNGKey(0)
    B, N, D, DC = 2, 64, 256, 32
    k1, k2, k3, k4, k5 = jax.random.split(key, 5)

    x = jax.random.normal(k1, (B, N, D), jnp.float32)
    gamma = 1.0 + 0.1 * jax.random.normal(k2, (D,), jnp.float32)
    cond = jax.random.normal(k3, (B, DC), jnp.float32)
    w_gb = 0.02 * jax.random.normal(k4, (DC, 2 * D), jnp.float32)
    b_gb = 0.02 * jax.random.normal(k5, (2 * D,), jnp.float32)

    # Non-conditional path.
    out_plain = rmsnorm(x, gamma=gamma)
    # Conditional path (to_gamma_beta Linear applied in the wrapper).
    out_cond = rmsnorm(x, gamma=gamma, cond=cond, w_gb=w_gb, b_gb=b_gb)
    jax.block_until_ready((out_plain, out_cond))

    ref_plain = _reference(x, gamma)
    ref_cond = _reference(x, gamma, cond, w_gb, b_gb)

    assert jnp.allclose(out_plain, ref_plain, atol=1e-4, rtol=1e-4), "non-cond mismatch"
    assert jnp.allclose(out_cond, ref_cond, atol=1e-4, rtol=1e-4), "cond mismatch"

    print("KERNEL_OK")
</pallas_src>

<mosaic_0001>
module attributes {stable_mosaic.version = 11 : i64} {
  func.func @_rmsnorm_kernel(%arg0: i32, %arg1: memref<128x256xf32, #tpu.memory_space<vmem>>, %arg2: memref<1x256xf32, #tpu.memory_space<vmem>>, %arg3: memref<128x256xf32, #tpu.memory_space<vmem>>) attributes {dimension_semantics = [#tpu.dimension_semantics<parallel>], iteration_bounds = array<i64: 1>, scalar_prefetch = 0 : i64, scratch_operands = 0 : i64, tpu.core_type = #tpu.core_type<tc>, window_params = [{transform_indices = @transform_0, window_bounds = array<i64: 128, 256>}, {pipeline_mode = #tpu.pipeline_mode<synchronous>, transform_indices = @transform_1, window_bounds = array<i64: 1, 256>}, {transform_indices = @transform_2, window_bounds = array<i64: 128, 256>}]} {
    %c0 = arith.constant 0 : index
    %c0_0 = arith.constant 0 : index
    %0 = vector.load %arg1[%c0, %c0_0] : memref<128x256xf32, #tpu.memory_space<vmem>>, vector<128x256xf32>
    %1 = arith.mulf %0, %0 : vector<128x256xf32>
    %cst = arith.constant dense<0.000000e+00> : vector<128xf32>
    %2 = vector.multi_reduction <add>, %1, %cst [1] : vector<128x256xf32> to vector<128xf32>
    %3 = vector.shape_cast %2 : vector<128xf32> to vector<128x1xf32>
    %cst_1 = arith.constant 1.000000e-24 : f32
    %4 = vector.broadcast %cst_1 : f32 to vector<128x1xf32>
    %5 = arith.maximumf %3, %4 : vector<128x1xf32>
    %6 = math.rsqrt %5 : vector<128x1xf32>
    %c0_2 = arith.constant 0 : index
    %c0_3 = arith.constant 0 : index
    %7 = vector.load %arg2[%c0_2, %c0_3] : memref<1x256xf32, #tpu.memory_space<vmem>>, vector<1x256xf32>
    %8 = vector.broadcast %6 : vector<128x1xf32> to vector<128x256xf32>
    %9 = arith.mulf %0, %8 : vector<128x256xf32>
    %cst_4 = arith.constant 1.600000e+01 : f32
    %10 = vector.broadcast %cst_4 : f32 to vector<1x256xf32>
    %11 = arith.mulf %10, %7 : vector<1x256xf32>
    %12 = vector.broadcast %11 : vector<1x256xf32> to vector<128x256xf32>
    %13 = arith.mulf %9, %12 : vector<128x256xf32>
    %c0_5 = arith.constant 0 : index
    %c0_6 = arith.constant 0 : index
    %14 = vector.load %arg3[%c0_5, %c0_6] : memref<128x256xf32, #tpu.memory_space<vmem>>, vector<128x256xf32>
    tpu.vector_store %arg3[%c0_5, %c0_6], %13 {strides = array<i32>} : memref<128x256xf32, #tpu.memory_space<vmem>>, vector<128x256xf32>,
    return
  }
  func.func @transform_0(%arg0: i32) -> (i32, i32) {
    %c0_i32 = arith.constant 0 : i32
    %c0_i32_0 = arith.constant 0 : i32
    return %arg0, %c0_i32 : i32, i32
  }
  func.func @transform_1(%arg0: i32) -> (i32, i32) {
    %c0_i32 = arith.constant 0 : i32
    %c0_i32_0 = arith.constant 0 : i32
    %c0_i32_1 = arith.constant 0 : i32
    return %c0_i32, %c0_i32_0 : i32, i32
  }
  func.func @transform_2(%arg0: i32) -> (i32, i32) {
    %c0_i32 = arith.constant 0 : i32
    %c0_i32_0 = arith.constant 0 : i32
    return %arg0, %c0_i32 : i32, i32
  }
}

</mosaic_0001>

<bundles_post_ra>
// kernel: tpu_custom_call.1
= control target key start
LH: loop header
LB: loop body
LE: loop exit
PB: predicated region body
PF: predicated region fallthrough
CT: control target
= control target key end

     0   :  { %7 = vsyncpa [#allocation3], 0  ;;  %s676_s0 = inlined_call_operand.hbm [shape: f32[128,256], index: 0, kind: input, shape index: {}]   ;;  %s677_s1 = inlined_call_operand.hbm [shape: f32[1,256], index: 1, kind: input, shape index: {}]   ;;  %s678_s2 = inlined_call_operand.hbm [shape: f32[128,256], index: 2, kind: output, shape index: {}]  }
   0x1   :  { %8 = vsyncpa [#allocation6], 0 }
   0x2   :  { %9 = vsyncpa [#allocation4], 0  ;;  %s418_s9 = smov [#allocation2]   ;;  %s346_s13 = scalar_lea.hbm %s676_s0, 4096 }
   0x3   :  { %s15_s10 = sshll.u32 %s418_s9, 4  ;;  %p347_p0 = scmp.ne.s32.totalorder %s676_s0, %s346_s13  ;;  %s16_s10 = int_to_ptr.vmem [resolvable:$true] %s15_s10 }
   0x4   :  { %p350_p1 = scmp.lt.u32.totalorder %s346_s13, %s676_s0 }
   0x6   :  { %p352_p2 = pnand %p350_p1, %p347_p0 }
   0x8   :  { %355 = shalt.err (!%p352_p2)
}
   0x9   :  { %s356_s18 = scalar_lea.vmem %s16_s10, 4096  ;;  %p361_p4 = scmp.lt.s32.totalorder %s16_s10, %s16_s10 }
   0xa   :  { %p357_p3 = scmp.ne.s32.totalorder %s16_s10, %s356_s18  ;;  %p362_p5 = scmp.lt.s32.totalorder %s356_s18, %s356_s18 }
   0xc   :  { %p363_p6 = por %p362_p5, %p361_p4 }
   0xe   :  { %p364_p7 = pnand %p363_p6, %p357_p3 }
  0x10   :  { %367 = shalt.err (!%p364_p7)
}
  0x11   :  { %s419_s19 = smov 256   ;;  %s420_s20 = smov 16  }
  0x12   :  { %21 = dma.hbm_to_vmem [thread:$0]  %s676_s0, 4096, %s16_s10, [#allocation3], %s419_s19, %s419_s19, %s420_s20  }
  0x13   :  { %s421_s23 = smov [#allocation5]   ;;  %s368_s27 = scalar_lea.hbm %s677_s1, 32 }
  0x14   :  { %s28_s24 = sshll.u32 %s421_s23, 4  ;;  %p369_p8 = scmp.ne.s32.totalorder %s677_s1, %s368_s27  ;;  %s29_s24 = int_to_ptr.vmem [resolvable:$true] %s28_s24 }
  0x15   :  { %p372_p9 = scmp.lt.u32.totalorder %s368_s27, %s677_s1 }
  0x17   :  { %p374_p10 = pnand %p372_p9, %p369_p8 }
  0x19   :  { %377 = shalt.err (!%p374_p10)
}
  0x1a   :  { %s378_s4 = scalar_lea.vmem %s29_s24, 32  ;;  %p383_p12 = scmp.lt.s32.totalorder %s29_s24, %s29_s24 }
  0x1b   :  { %p379_p11 = scmp.ne.s32.totalorder %s29_s24, %s378_s4  ;;  %p384_p13 = scmp.lt.s32.totalorder %s378_s4, %s378_s4 }
  0x1d   :  { %p385_p0 = por %p384_p13, %p383_p12 }
  0x1f   :  { %p386_p1 = pnand %p385_p0, %p379_p11 }
  0x21   :  { %389 = shalt.err (!%p386_p1)
}
  0x22   :  { %31 = dma.hbm_to_vmem [thread:$0]  %s677_s1, 32, %s29_s24, [#allocation6]  }
  0x23   :  { %412 = dma.done.wait [#allocation3], 4096  }
  0x24   :  { %413 = vsyncadd [#allocation3], 4294963200 }
  0x25   :  { %414 = dma.done.wait [#allocation6], 32  }
  0x26   :  { %415 = vsyncadd [#allocation6], 4294967264  ;;  %v465_v0 = vld [vmem:[#allocation2 + $0x20] sm:$0xff]  ;;  %v467_v1 = vld [vmem:[#allocation2 + $0x28] sm:$0xff]  ;;  %s422_s1 = smov [#allocation7]  }
  0x27   :  { %v469_v2 = vld [vmem:[#allocation2] sm:$0xff]  ;;  %v74_v3 = vmul.f32 %v465_v0, %v465_v0  ;;  %v75_v4 = vmul.f32 %v467_v1, %v467_v1  ;;  %v475_v5 = vld [vmem:[#allocation2 + $0x8] sm:$0xff]  ;;  %v479_v7 = vld [vmem:[#allocation2 + $0x30] sm:$0xff]  ;;  %s296_s6 = sshll.u32 %s422_s1, 4  ;;  %s297_s6 = int_to_ptr.vmem [resolvable:$true] %s296_s6 }
  0x28   :  { %v70_v6 = vmul.f32 %v469_v2, %v469_v2  ;;  %v481_v8 = vld [vmem:[#allocation2 + $0x38] sm:$0xff]  ;;  %v71_v9 = vmul.f32 %v475_v5, %v475_v5  ;;  %v76_v10 = vmul.f32 %v479_v7, %v479_v7  ;;  %v489_v12 = vld [vmem:[#allocation2 + $0x10] sm:$0xff]  ;;  %v501_v19 = vld [vmem:[#allocation2 + $0x40] sm:$0xff]  ;;  %s390_s7 = scalar_lea.vmem %s297_s6, 4096  ;;  %p395_p3 = scmp.lt.s32.totalorder %s297_s6, %s297_s6 }
  0x29   :  { %v77_v11 = vmul.f32 %v481_v8, %v481_v8  ;;  %v491_v13 = vld [vmem:[#allocation2 + $0x18] sm:$0xff]  ;;  %v493_v14 = vld [vmem:[#allocation2 + $0x50] sm:$0xff]  ;;  %v108_v15 = vadd.f32 %v75_v4, %v74_v3  ;;  %v72_v16 = vmul.f32 %v489_v12, %v489_v12  ;;  %v503_v20 = vld [vmem:[#allocation2 + $0x48] sm:$0xff]  ;;  %v78_v26 = vmul.f32 %v501_v19, %v501_v19  ;;  %p391_p2 = scmp.ne.s32.totalorder %s297_s6, %s390_s7  ;;  %p396_p4 = scmp.lt.s32.totalorder %s390_s7, %s390_s7 }
  0x2a   :  { %v73_v17 = vmul.f32 %v491_v13, %v491_v13  ;;  %v499_v18 = vld [vmem:[#allocation2 + $0x58] sm:$0xff]  ;;  %v102_v21 = vadd.f32 %v71_v9, %v70_v6  ;;  %v80_v23 = vmul.f32 %v493_v14, %v493_v14  ;;  %v79_v27 = vmul.f32 %v503_v20, %v503_v20  ;;  %v513_v28 = vld [vmem:[#allocation2 + $0x70] sm:$0xff]  ;;  %v517_v30 = vld [vmem:[#allocation2 + $0x60] sm:$0xff] }
  0x2b   :  { %109 = vadd.xlane.f32.xlu1 %v108_v15  ;;  %v111_v22 = vadd.f32 %v77_v11, %v76_v10  ;;  %v81_v24 = vmul.f32 %v499_v18, %v499_v18  ;;  %v515_v29 = vld [vmem:[#allocation2 + $0x78] sm:$0xff]  ;;  %v519_v31 = vld [vmem:[#allocation2 + $0x68] sm:$0xff]  ;;  %v84_v33 = vmul.f32 %v513_v28, %v513_v28  ;;  %v82_v36 = vmul.f32 %v517_v30, %v517_v30  ;;  %v529_v38 = vld [vmem:[#allocation2 + $0x90] sm:$0xff]  ;;  %p397_p5 = por %p396_p4, %p395_p3 }
  0x2c   :  { %103 = vadd.xlane.f32.xlu0 %v102_v21  ;;  %v105_v25 = vadd.f32 %v73_v17, %v72_v16  ;;  %v85_v34 = vmul.f32 %v515_v29, %v515_v29  ;;  %v114_v35 = vadd.f32 %v79_v27, %v78_v26  ;;  %v83_v37 = vmul.f32 %v519_v31, %v519_v31  ;;  %v531_v39 = vld [vmem:[#allocation2 + $0x98] sm:$0xff]  ;;  %v533_v40 = vld [vmem:[#allocation2 + $0x80] sm:$0xff]  ;;  %v535_v41 = vld [vmem:[#allocation2 + $0x88] sm:$0xff] }
  0x2d   :  { %v117_v32 = vadd.f32 %v81_v24, %v80_v23  ;;  %v88_v43 = vmul.f32 %v529_v38, %v529_v38  ;;  %v89_v44 = vmul.f32 %v531_v39, %v531_v39  ;;  %v86_v46 = vmul.f32 %v533_v40, %v533_v40  ;;  %v545_v48 = vld [vmem:[#allocation2 + $0xb0] sm:$0xff]  ;;  %v547_v49 = vld [vmem:[#allocation2 + $0xb8] sm:$0xff]  ;;  %v549_v50 = vld [vmem:[#allocation2 + $0xa0] sm:$0xff]  ;;  %p398_p6 = pnand %p397_p5, %p391_p2 }
  0x2e   :  { %v123_v42 = vadd.f32 %v85_v34, %v84_v33  ;;  %v120_v45 = vadd.f32 %v83_v37, %v82_v36  ;;  %v87_v47 = vmul.f32 %v535_v41, %v535_v41  ;;  %v551_v51 = vld [vmem:[#allocation2 + $0xa8] sm:$0xff]  ;;  %v92_v53 = vmul.f32 %v545_v48, %v545_v48  ;;  %v561_v58 = vld [vmem:[#allocation2 + $0xd0] sm:$0xff]  ;;  %v563_v59 = vld [vmem:[#allocation2 + $0xd8] sm:$0xff] }
  0x2f   :  { %112 = vadd.xlane.f32.xlu1 %v111_v22  ;;  %v129_v52 = vadd.f32 %v89_v44, %v88_v43  ;;  %v93_v54 = vmul.f32 %v547_v49, %v547_v49  ;;  %v90_v56 = vmul.f32 %v549_v50, %v549_v50  ;;  %v91_v57 = vmul.f32 %v551_v51, %v551_v51  ;;  %v565_v60 = vld [vmem:[#allocation2 + $0xc0] sm:$0xff]  ;;  %v567_v61 = vld [vmem:[#allocation2 + $0xc8] sm:$0xff]  ;;  %v577_v10 = vld [vmem:[#allocation2 + $0xf0] sm:$0xff] }
  0x30   :  { %106 = vadd.xlane.f32.xlu0 %v105_v25  ;;  %v126_v55 = vadd.f32 %v87_v47, %v86_v46  ;;  %v96_v63 = vmul.f32 %v561_v58, %v561_v58  ;;  %v97_v3 = vmul.f32 %v563_v59, %v563_v59  ;;  %v94_v6 = vmul.f32 %v565_v60, %v565_v60  ;;  %v579_v11 = vld [vmem:[#allocation2 + $0xf8] sm:$0xff]  ;;  %v581_v15 = vld [vmem:[#allocation2 + $0xe0] sm:$0xff]  ;;  %v583_v16 = vld [vmem:[#allocation2 + $0xe8] sm:$0xff] }
  0x31   :  { %v135_v62 = vadd.f32 %v93_v54, %v92_v53  ;;  %v132_v4 = vadd.f32 %v91_v57, %v90_v56  ;;  %v95_v9 = vmul.f32 %v567_v61, %v567_v61  ;;  %v100_v21 = vmul.f32 %v577_v10, %v577_v10  ;;  %v182_v43 = vld [vmem:[#allocation5] sm:$0x3] }
  0x32   :  { %v141_v17 = vadd.f32 %v97_v3, %v96_v63  ;;  %v101_v22 = vmul.f32 %v579_v11, %v579_v11  ;;  %v98_v24 = vmul.f32 %v581_v15, %v581_v15  ;;  %v99_v25 = vmul.f32 %v583_v16, %v583_v16 }
  0x33   :  { %118 = vadd.xlane.f32.xlu1 %v117_v32  ;;  %v138_v23 = vadd.f32 %v95_v9, %v94_v6  ;;  %v217_v32 = vlaneseq  ;;  %v215_v47 = vmul.f32 16.0, %v182_v43 }
  0x34   :  { %115 = vadd.xlane.f32.xlu0 %v114_v35  ;;  %v147_v26 = vadd.f32 %v101_v22, %v100_v21  ;;  %v144_v27 = vadd.f32 %v99_v25, %v98_v24 }
  0x35   :  { %v218_v37 = vshrl.u32 %v217_v32, 7 }
  0x37   :  { %124 = vadd.xlane.f32.xlu1 %v123_v42  ;;  %v223_v53 = vsub.s32 1, %v218_v37 }
  0x38   :  { %121 = vadd.xlane.f32.xlu0 %v120_v45 }
  0x39   :  { %v595_v63 = vrot.slane %v215_v47, %v223_v53 }
  0x3b   :  { %130 = vadd.xlane.f32.xlu1 %v129_v52  ;;  %v219_v52 = vsub.s32 0, %v218_v37 }
  0x3c   :  { %127 = vadd.xlane.f32.xlu0 %v126_v55 }
  0x3f   :  { %136 = vadd.xlane.f32.xlu1 %v135_v62  ;;  %v593_v62 = vrot.slane %v215_v47, %v219_v52 }
  0x40   :  { %133 = vadd.xlane.f32.xlu0 %v132_v4 }
  0x43   :  { %142 = vadd.xlane.f32.xlu1 %v141_v17 }
  0x44   :  { %139 = vadd.xlane.f32.xlu0 %v138_v23 }
  0x47   :  { %148 = vadd.xlane.f32.xlu1 %v147_v26 }
  0x48   :  { %145 = vadd.xlane.f32.xlu0 %v144_v27 }
  0xb8   :  { %v110_v33 = vpop.xlane.xlu1 %109 }
  0xb9   :  { %v152_v34 = vmax.f32 %v110_v33, 1e-24  ;;  %v104_v35 = vpop.xlane.xlu0 %103 }
  0xba   :  { %v150_v36 = vmax.f32 %v104_v35, 1e-24 }
  0xbb   :  { %314 = vrsqrt.f32 %v152_v34 }
  0xbc   :  { %316 = vrsqrt.f32 %v150_v36  ;;  %v113_v42 = vpop.xlane.xlu1 %112 }
  0xbd   :  { %v153_v44 = vmax.f32 %v113_v42, 1e-24  ;;  %v107_v45 = vpop.xlane.xlu0 %106 }
  0xbe   :  { %v151_v46 = vmax.f32 %v107_v45, 1e-24 }
  0xbf   :  { %318 = vrsqrt.f32 %v153_v44 }
  0xc0   :  { %320 = vrsqrt.f32 %v151_v46  ;;  %v119_v54 = vpop.xlane.xlu1 %118 }
  0xc1   :  { %v155_v55 = vmax.f32 %v119_v54, 1e-24  ;;  %v116_v56 = vpop.xlane.xlu0 %115 }
  0xc2   :  { %v154_v57 = vmax.f32 %v116_v56, 1e-24 }
  0xc3   :  { %322 = vrsqrt.f32 %v155_v55 }
  0xc4   :  { %324 = vrsqrt.f32 %v154_v57  ;;  %v125_v3 = vpop.xlane.xlu1 %124 }
  0xc5   :  { %v315_v4 = vpop.eup %314  ;;  %v157_v6 = vmax.f32 %v125_v3, 1e-24  ;;  %v122_v9 = vpop.xlane.xlu0 %121 }
  0xc6   :  { %v317_v17 = vpop.eup %316  ;;  %v187_v21 = vmul.f32 %v315_v4, %v465_v0  ;;  %v188_v22 = vmul.f32 %v315_v4, %v467_v1  ;;  %v156_v23 = vmax.f32 %v122_v9, 1e-24 }
  0xc7   :  { %v183_v24 = vmul.f32 %v317_v17, %v469_v2  ;;  %v184_v25 = vmul.f32 %v317_v17, %v475_v5  ;;  %326 = vrsqrt.f32 %v157_v6 }
  0xc8   :  { %v231_v26 = vmul.f32 %v593_v62, %v187_v21  ;;  %v232_v27 = vmul.f32 %v595_v63, %v188_v22  ;;  %328 = vrsqrt.f32 %v156_v23  ;;  %v131_v32 = vpop.xlane.xlu1 %130 }
  0xc9   :  { %v319_v33 = vpop.eup %318  ;;  %v227_v34 = vmul.f32 %v593_v62, %v183_v24  ;;  %v228_v35 = vmul.f32 %v595_v63, %v184_v25  ;;  %v159_v0 = vmax.f32 %v131_v32, 1e-24  ;;  %v128_v36 = vpop.xlane.xlu0 %127 }
  0xca   :  { %v321_v1 = vpop.eup %320  ;;  %263 = vst [vmem:[#allocation7 + $0x20] sm:$0xff] %v231_v26  ;;  %264 = vst [vmem:[#allocation7 + $0x28] sm:$0xff] %v232_v27  ;;  %v189_v2 = vmul.f32 %v319_v33, %v479_v7  ;;  %v190_v5 = vmul.f32 %v319_v33, %v481_v8  ;;  %v158_v37 = vmax.f32 %v128_v36, 1e-24 }
  0xcb   :  { %259 = vst [vmem:[#allocation7] sm:$0xff] %v227_v34  ;;  %260 = vst [vmem:[#allocation7 + $0x8] sm:$0xff] %v228_v35  ;;  %v185_v42 = vmul.f32 %v321_v1, %v489_v12  ;;  %v186_v43 = vmul.f32 %v321_v1, %v491_v13  ;;  %330 = vrsqrt.f32 %v159_v0 }
  0xcc   :  { %v233_v44 = vmul.f32 %v593_v62, %v189_v2  ;;  %v234_v45 = vmul.f32 %v595_v63, %v190_v5  ;;  %332 = vrsqrt.f32 %v158_v37  ;;  %v137_v46 = vpop.xlane.xlu1 %136 }
  0xcd   :  { %v323_v47 = vpop.eup %322  ;;  %v229_v52 = vmul.f32 %v593_v62, %v185_v42  ;;  %v230_v7 = vmul.f32 %v595_v63, %v186_v43  ;;  %v161_v8 = vmax.f32 %v137_v46, 1e-24  ;;  %v134_v53 = vpop.xlane.xlu0 %133 }
  0xce   :  { %v325_v54 = vpop.eup %324  ;;  %265 = vst [vmem:[#allocation7 + $0x30] sm:$0xff] %v233_v44  ;;  %266 = vst [vmem:[#allocation7 + $0x38] sm:$0xff] %v234_v45  ;;  %v193_v12 = vmul.f32 %v323_v47, %v493_v14  ;;  %v194_v13 = vmul.f32 %v323_v47, %v499_v18  ;;  %v160_v55 = vmax.f32 %v134_v53, 1e-24 }
  0xcf   :  { %261 = vst [vmem:[#allocation7 + $0x10] sm:$0xff] %v229_v52  ;;  %262 = vst [vmem:[#allocation7 + $0x18] sm:$0xff] %v230_v7  ;;  %v191_v56 = vmul.f32 %v325_v54, %v501_v19  ;;  %v192_v57 = vmul.f32 %v325_v54, %v503_v20  ;;  %334 = vrsqrt.f32 %v161_v8 }
  0xd0   :  { %v237_v3 = vmul.f32 %v593_v62, %v193_v12  ;;  %v238_v4 = vmul.f32 %v595_v63, %v194_v13  ;;  %336 = vrsqrt.f32 %v160_v55  ;;  %v143_v6 = vpop.xlane.xlu1 %142 }
  0xd1   :  { %v327_v9 = vpop.eup %326  ;;  %v235_v17 = vmul.f32 %v593_v62, %v191_v56  ;;  %v236_v14 = vmul.f32 %v595_v63, %v192_v57  ;;  %v163_v18 = vmax.f32 %v143_v6, 1e-24  ;;  %v140_v21 = vpop.xlane.xlu0 %139 }
  0xd2   :  { %v329_v22 = vpop.eup %328  ;;  %269 = vst [vmem:[#allocation7 + $0x50] sm:$0xff] %v237_v3  ;;  %270 = vst [vmem:[#allocation7 + $0x58] sm:$0xff] %v238_v4  ;;  %v197_v19 = vmul.f32 %v327_v9, %v513_v28  ;;  %v198_v20 = vmul.f32 %v327_v9, %v515_v29  ;;  %v162_v23 = vmax.f32 %v140_v21, 1e-24 }
  0xd3   :  { %267 = vst [vmem:[#allocation7 + $0x40] sm:$0xff] %v235_v17  ;;  %268 = vst [vmem:[#allocation7 + $0x48] sm:$0xff] %v236_v14  ;;  %v195_v24 = vmul.f32 %v329_v22, %v517_v30  ;;  %v196_v25 = vmul.f32 %v329_v22, %v519_v31  ;;  %338 = vrsqrt.f32 %v163_v18 }
  0xd4   :  { %v241_v26 = vmul.f32 %v593_v62, %v197_v19  ;;  %v242_v27 = vmul.f32 %v595_v63, %v198_v20  ;;  %340 = vrsqrt.f32 %v162_v23  ;;  %v149_v32 = vpop.xlane.xlu1 %148 }
  0xd5   :  { %v331_v33 = vpop.eup %330  ;;  %v239_v34 = vmul.f32 %v593_v62, %v195_v24  ;;  %v240_v28 = vmul.f32 %v595_v63, %v196_v25  ;;  %v165_v29 = vmax.f32 %v149_v32, 1e-24  ;;  %v146_v35 = vpop.xlane.xlu0 %145 }
  0xd6   :  { %v333_v0 = vpop.eup %332  ;;  %273 = vst [vmem:[#allocation7 + $0x70] sm:$0xff] %v241_v26  ;;  %274 = vst [vmem:[#allocation7 + $0x78] sm:$0xff] %v242_v27  ;;  %v201_v30 = vmul.f32 %v331_v33, %v529_v38  ;;  %v202_v31 = vmul.f32 %v331_v33, %v531_v39  ;;  %v164_v36 = vmax.f32 %v146_v35, 1e-24 }
  0xd7   :  { %271 = vst [vmem:[#allocation7 + $0x60] sm:$0xff] %v239_v34  ;;  %272 = vst [vmem:[#allocation7 + $0x68] sm:$0xff] %v240_v28  ;;  %v199_v1 = vmul.f32 %v333_v0, %v533_v40  ;;  %v200_v2 = vmul.f32 %v333_v0, %v535_v41  ;;  %342 = vrsqrt.f32 %v165_v29 }
  0xd8   :  { %v245_v5 = vmul.f32 %v593_v62, %v201_v30  ;;  %v246_v37 = vmul.f32 %v595_v63, %v202_v31  ;;  %344 = vrsqrt.f32 %v164_v36 }
  0xd9   :  { %v335_v42 = vpop.eup %334  ;;  %v243_v43 = vmul.f32 %v593_v62, %v199_v1  ;;  %v244_v38 = vmul.f32 %v595_v63, %v200_v2 }
  0xda   :  { %v337_v44 = vpop.eup %336  ;;  %277 = vst [vmem:[#allocation7 + $0x90] sm:$0xff] %v245_v5  ;;  %278 = vst [vmem:[#allocation7 + $0x98] sm:$0xff] %v246_v37  ;;  %v205_v39 = vmul.f32 %v335_v42, %v545_v48  ;;  %v206_v40 = vmul.f32 %v335_v42, %v547_v49 }
  0xdb   :  { %275 = vst [vmem:[#allocation7 + $0x80] sm:$0xff] %v243_v43  ;;  %276 = vst [vmem:[#allocation7 + $0x88] sm:$0xff] %v244_v38  ;;  %v203_v41 = vmul.f32 %v337_v44, %v549_v50  ;;  %v204_v45 = vmul.f32 %v337_v44, %v551_v51 }
  0xdc   :  { %v249_v46 = vmul.f32 %v593_v62, %v205_v39  ;;  %v250_v47 = vmul.f32 %v595_v63, %v206_v40 }
  0xdd   :  { %v339_v52 = vpop.eup %338  ;;  %v247_v7 = vmul.f32 %v593_v62, %v203_v41  ;;  %v248_v8 = vmul.f32 %v595_v63, %v204_v45 }
  0xde   :  { %v341_v53 = vpop.eup %340  ;;  %281 = vst [vmem:[#allocation7 + $0xb0] sm:$0xff] %v249_v46  ;;  %282 = vst [vmem:[#allocation7 + $0xb8] sm:$0xff] %v250_v47  ;;  %v209_v48 = vmul.f32 %v339_v52, %v561_v58  ;;  %v210_v49 = vmul.f32 %v339_v52, %v563_v59 }
  0xdf   :  { %279 = vst [vmem:[#allocation7 + $0xa0] sm:$0xff] %v247_v7  ;;  %280 = vst [vmem:[#allocation7 + $0xa8] sm:$0xff] %v248_v8  ;;  %v207_v50 = vmul.f32 %v341_v53, %v565_v60  ;;  %v208_v51 = vmul.f32 %v341_v53, %v567_v61 }
  0xe0   :  { %v253_v54 = vmul.f32 %v593_v62, %v209_v48  ;;  %v254_v12 = vmul.f32 %v595_v63, %v210_v49 }
  0xe1   :  { %v343_v13 = vpop.eup %342  ;;  %v251_v55 = vmul.f32 %v593_v62, %v207_v50  ;;  %v252_v56 = vmul.f32 %v595_v63, %v208_v51 }
  0xe2   :  { %v345_v57 = vpop.eup %344  ;;  %285 = vst [vmem:[#allocation7 + $0xd0] sm:$0xff] %v253_v54  ;;  %286 = vst [vmem:[#allocation7 + $0xd8] sm:$0xff] %v254_v12  ;;  %v213_v58 = vmul.f32 %v343_v13, %v577_v10  ;;  %v214_v59 = vmul.f32 %v343_v13, %v579_v11 }
  0xe3   :  { %283 = vst [vmem:[#allocation7 + $0xc0] sm:$0xff] %v251_v55  ;;  %284 = vst [vmem:[#allocation7 + $0xc8] sm:$0xff] %v252_v56  ;;  %v211_v60 = vmul.f32 %v345_v57, %v581_v15  ;;  %v212_v61 = vmul.f32 %v345_v57, %v583_v16 }
  0xe4   :  { %v257_v3 = vmul.f32 %v593_v62, %v213_v58  ;;  %v258_v4 = vmul.f32 %v595_v63, %v214_v59 }
  0xe5   :  { %v255_v6 = vmul.f32 %v593_v62, %v211_v60  ;;  %v256_v9 = vmul.f32 %v595_v63, %v212_v61 }
  0xe6   :  { %289 = vst [vmem:[#allocation7 + $0xf0] sm:$0xff] %v257_v3  ;;  %290 = vst [vmem:[#allocation7 + $0xf8] sm:$0xff] %v258_v4 }
  0xe7   :  { %287 = vst [vmem:[#allocation7 + $0xe0] sm:$0xff] %v255_v6  ;;  %288 = vst [vmem:[#allocation7 + $0xe8] sm:$0xff] %v256_v9 }
  0xe8   :  { %401 = shalt.err (!%p398_p6)
}
  0xe9   :  { %s402_s10 = scalar_lea.hbm %s678_s2, 4096 }
  0xea   :  { %p403_p7 = scmp.ne.s32.totalorder %s678_s2, %s402_s10  ;;  %p406_p8 = scmp.lt.u32.totalorder %s402_s10, %s678_s2 }
  0xec   :  { %p408_p9 = pnand %p406_p8, %p403_p7 }
  0xee   :  { %411 = shalt.err (!%p408_p9)
}
  0xef   :  { %302 = dma.vmem_to_hbm [thread:$0]  %s297_s6, 4096, %s678_s2, [#allocation4], %s419_s19, %s419_s19, %s420_s20  }
  0xf0   :  { %416 = dma.done.wait [#allocation4], 4096  }
  0xf1   :  { %417 = vsyncadd [#allocation4], 4294963200 }
  0xf2   :  { %306 = vsyncpa [#allocation3], 1 }
  0xf3   :  { %307 = vsyncpa [#allocation6], 1 }
  0xf4   :  { %308 = vsyncpa [#allocation4], 1 }

</bundles_post_ra>
